<compile_context>
chip_gen: v7x
topology: tpu7x:2x2x1
jax: 0.10.0
libtpu: 0.0.40
codegen_flags: <defaults>
</compile_context>

<pallas_src>
import jax
import jax.numpy as jnp
from jax.experimental import pallas as pl
from jax.experimental.pallas import tpu as pltpu


def _city_embedding_kernel(xf_ref, wd_ref, bd_ref, wc_ref, bc_ref,
                           depot_ref, city_ref):
    """Fused depot/city linear projections for one batch tile.

    xf_ref:    [tb, N*D]      flattened nodes (node n occupies lanes n*D..n*D+D-1)
    wd_ref:    [D, E]         depot weight (stored [in, out])
    bd_ref:    [1, E]         depot bias
    wc_ref:    [D, E]         city weight
    bc_ref:    [1, E]         city bias
    depot_ref: [tb, E]        depot embedding (node 0)
    city_ref:  [tb, (N-1)*E]  city embeddings, node n at lanes (n-1)*E..n*E-1
    """
    D = wd_ref.shape[0]
    E = wd_ref.shape[1]
    N = xf_ref.shape[1] // D

    xf = xf_ref[...].astype(jnp.float32)        # (tb, N*D) single dense load
    wd = wd_ref[...].astype(jnp.float32)        # (D, E)
    wc = wc_ref[...].astype(jnp.float32)        # (D, E)
    bd = bd_ref[...].astype(jnp.float32)        # (1, E)
    bc = bc_ref[...].astype(jnp.float32)        # (1, E)

    def node_proj(n, w, b):
        # Features of node n sit at static lanes [n*D, (n+1)*D).
        # (tb,1) * (1,E) broadcasts -> (tb,E); pure VPU, no zeros-init.
        acc = xf[:, n * D:n * D + 1] * w[0:1, :]
        for k in range(1, D):
            acc = acc + xf[:, n * D + k:n * D + k + 1] * w[k:k + 1, :]
        return acc + b

    # Depot (node 0): dense 2-D store, no sublane padding.
    depot_ref[...] = node_proj(0, wd, bd).astype(depot_ref.dtype)

    # City nodes 1..N-1: write each (tb, E) result into its static lane window
    # of the flat, lane-dense city slab.
    # TODO(synk): for very large N, switch this static unroll to lax.fori_loop
    # with pl.ds lane offsets to keep compile time bounded.
    for n in range(1, N):
        city_ref[:, (n - 1) * E:n * E] = node_proj(n, wc, bc).astype(city_ref.dtype)


def _round_up(v, m):
    return ((v + m - 1) // m) * m


class CityEmbeddingPallas:
    """JAX/Pallas port of CityEmbedding. hidden_dim is unused in forward
    (kept only for signature parity with the PyTorch module)."""

    def __init__(self, input_dim, hidden_dim, embed_dim, key):
        self.input_dim = input_dim
        self.hidden_dim = hidden_dim
        self.embed_dim = embed_dim
        kd_w, kd_b, kc_w, kc_b = jax.random.split(key, 4)
        # nn.Linear default init: U(-1/sqrt(in), 1/sqrt(in)); weight [out, in].
        bound = 1.0 / float(input_dim) ** 0.5
        # store transposed weights [in, out] for x @ W
        self.depot_w = jax.random.uniform(
            kd_w, (input_dim, embed_dim), jnp.float32, -bound, bound)
        self.depot_b = jax.random.uniform(
            kd_b, (embed_dim,), jnp.float32, -bound, bound)
        self.city_w = jax.random.uniform(
            kc_w, (input_dim, embed_dim), jnp.float32, -bound, bound)
        self.city_b = jax.random.uniform(
            kc_b, (embed_dim,), jnp.float32, -bound, bound)

    def __call__(self, city):
        """city: [B, N, input_dim] -> (depot_embed [B,1,E], city_embed [B,N-1,E])"""
        B, N, D = city.shape
        E = self.embed_dim

        if N == 1:
            # No non-depot nodes: a (tb, 0, E) city block is not representable;
            # handle the depot-only edge case with plain XLA (tiny anyway).
            depot = (jnp.einsum('bnd,de->bne', city.astype(jnp.float32),
                                self.depot_w) + self.depot_b).astype(city.dtype)
            return depot, jnp.zeros((B, 0, E), city.dtype)

        itemsize = jnp.dtype(city.dtype).itemsize
        x_flat = city.reshape(B, N * D)          # free, contiguous view

        # --- Batch-tile sizing against PADDED VMEM bytes ------------------
        # Each 2-D block packs tb rows on sublanes and pads lanes to 128;
        # x2 for double buffering of input and both outputs.  Weights are
        # tiny and resident (constant index_map), covered by the headroom.
        per_row_bytes = 2 * itemsize * (_round_up(N * D, 128)
                                        + _round_up(E, 128)
                                        + _round_up((N - 1) * E, 128))
        vmem_limit = 48 << 20                    # works on v5e/v6e/v7x
        budget = 32 << 20                        # tile budget under the limit
        tb_cap = max(1, min(B, budget // per_row_bytes))

        if B < 16 or tb_cap < 8:
            # Tiny problems: one (or a few) full-batch block(s).
            tb = min(B, max(1, tb_cap))
        else:
            # Multiple-of-8 tile, >=2 grid steps (keeps both v7x TCs busy),
            # prefer a divisor of B so there is no ragged last block.
            cap = min(tb_cap, max(8, pl.cdiv(B, 2)))
            cap = max(8, (cap // 8) * 8)
            divs = [d for d in range(8, cap + 1, 8) if B % d == 0]
            tb = max(divs) if divs else cap
        grid = (pl.cdiv(B, tb),)

        depot2d, city2d = pl.pallas_call(
            _city_embedding_kernel,
            out_shape=(
                jax.ShapeDtypeStruct((B, E), city.dtype),
                jax.ShapeDtypeStruct((B, (N - 1) * E), city.dtype),
            ),
            grid_spec=pl.GridSpec(
                grid=grid,
                in_specs=[
                    pl.BlockSpec((tb, N * D), lambda i: (i, 0)),   # flat nodes
                    pl.BlockSpec((D, E), lambda i: (0, 0)),        # depot_w (resident)
                    pl.BlockSpec((1, E), lambda i: (0, 0)),        # depot_b
                    pl.BlockSpec((D, E), lambda i: (0, 0)),        # city_w
                    pl.BlockSpec((1, E), lambda i: (0, 0)),        # city_b
                ],
                out_specs=[
                    pl.BlockSpec((tb, E), lambda i: (i, 0)),            # depot
                    pl.BlockSpec((tb, (N - 1) * E), lambda i: (i, 0)),  # city (flat)
                ],
            ),
            compiler_params=pltpu.CompilerParams(
                dimension_semantics=("parallel",),
                vmem_limit_bytes=vmem_limit),
        )(x_flat, self.depot_w, self.depot_b.reshape(1, E),
          self.city_w, self.city_b.reshape(1, E))

        # Free, contiguous reshapes back to the module's output shapes.
        return depot2d.reshape(B, 1, E), city2d.reshape(B, N - 1, E)


if __name__ == "__main__":
    key = jax.random.PRNGKey(0)
    k_param, k_city = jax.random.split(key)

    B, N, input_dim = 2, 8, 2
    hidden_dim, embed_dim = 64, 32

    module = CityEmbeddingPallas(input_dim, hidden_dim, embed_dim, k_param)
    city = jax.random.uniform(k_city, (B, N, input_dim), jnp.float32)

    depot_embed, city_embed = module(city)
    jax.block_until_ready((depot_embed, city_embed))

    # pure-JAX reference (highest precision so the f32 comparison is tight)
    ref_depot = jnp.einsum('bnd,de->bne', city[:, 0:1], module.depot_w,
                           precision=jax.lax.Precision.HIGHEST) + module.depot_b
    ref_city = jnp.einsum('bnd,de->bne', city[:, 1:], module.city_w,
                          precision=jax.lax.Precision.HIGHEST) + module.city_b

    assert depot_embed.shape == (B, 1, embed_dim)
    assert city_embed.shape == (B, N - 1, embed_dim)
    assert jnp.allclose(depot_embed, ref_depot, atol=1e-5)
    assert jnp.allclose(city_embed, ref_city, atol=1e-5)

    print("KERNEL_OK")
</pallas_src>

<mosaic_0001>
module attributes {stable_mosaic.version = 11 : i64} {
  func.func @_city_embedding_kernel(%arg0: i32, %arg1: memref<2x16xf32, #tpu.memory_space<vmem>>, %arg2: memref<2x32xf32, #tpu.memory_space<vmem>>, %arg3: memref<1x32xf32, #tpu.memory_space<vmem>>, %arg4: memref<2x32xf32, #tpu.memory_space<vmem>>, %arg5: memref<1x32xf32, #tpu.memory_space<vmem>>, %arg6: memref<2x32xf32, #tpu.memory_space<vmem>>, %arg7: memref<2x224xf32, #tpu.memory_space<vmem>>) attributes {dimension_semantics = [#tpu.dimension_semantics<parallel>], iteration_bounds = array<i64: 1>, scalar_prefetch = 0 : i64, scratch_operands = 0 : i64, tpu.core_type = #tpu.core_type<tc>, window_params = [{transform_indices = @transform_0, window_bounds = array<i64: 2, 16>}, {pipeline_mode = #tpu.pipeline_mode<synchronous>, transform_indices = @transform_1, window_bounds = array<i64: 2, 32>}, {pipeline_mode = #tpu.pipeline_mode<synchronous>, transform_indices = @transform_2, window_bounds = array<i64: 1, 32>}, {pipeline_mode = #tpu.pipeline_mode<synchronous>, transform_indices = @transform_3, window_bounds = array<i64: 2, 32>}, {pipeline_mode = #tpu.pipeline_mode<synchronous>, transform_indices = @transform_4, window_bounds = array<i64: 1, 32>}, {transform_indices = @transform_5, window_bounds = array<i64: 2, 32>}, {transform_indices = @transform_6, window_bounds = array<i64: 2, 224>}]} {
    %c0 = arith.constant 0 : index
    %c0_0 = arith.constant 0 : index
    %0 = vector.load %arg1[%c0, %c0_0] : memref<2x16xf32, #tpu.memory_space<vmem>>, vector<2x16xf32>
    %c0_1 = arith.constant 0 : index
    %c0_2 = arith.constant 0 : index
    %1 = vector.load %arg2[%c0_1, %c0_2] : memref<2x32xf32, #tpu.memory_space<vmem>>, vector<2x32xf32>
    %c0_3 = arith.constant 0 : index
    %c0_4 = arith.constant 0 : index
    %2 = vector.load %arg4[%c0_3, %c0_4] : memref<2x32xf32, #tpu.memory_space<vmem>>, vector<2x32xf32>
    %c0_5 = arith.constant 0 : index
    %c0_6 = arith.constant 0 : index
    %3 = vector.load %arg3[%c0_5, %c0_6] : memref<1x32xf32, #tpu.memory_space<vmem>>, vector<1x32xf32>
    %c0_7 = arith.constant 0 : index
    %c0_8 = arith.constant 0 : index
    %4 = vector.load %arg5[%c0_7, %c0_8] : memref<1x32xf32, #tpu.memory_space<vmem>>, vector<1x32xf32>
    %5 = vector.extract_strided_slice %0 {offsets = [0, 0], sizes = [2, 1], strides = [1, 1]} : vector<2x16xf32> to vector<2x1xf32>
    %6 = vector.extract_strided_slice %1 {offsets = [0, 0], sizes = [1, 32], strides = [1, 1]} : vector<2x32xf32> to vector<1x32xf32>
    %7 = vector.broadcast %5 : vector<2x1xf32> to vector<2x32xf32>
    %8 = vector.broadcast %6 : vector<1x32xf32> to vector<2x32xf32>
    %9 = arith.mulf %7, %8 : vector<2x32xf32>
    %10 = vector.extract_strided_slice %0 {offsets = [0, 1], sizes = [2, 1], strides = [1, 1]} : vector<2x16xf32> to vector<2x1xf32>
    %11 = vector.extract_strided_slice %1 {offsets = [1, 0], sizes = [1, 32], strides = [1, 1]} : vector<2x32xf32> to vector<1x32xf32>
    %12 = vector.broadcast %10 : vector<2x1xf32> to vector<2x32xf32>
    %13 = vector.broadcast %11 : vector<1x32xf32> to vector<2x32xf32>
    %14 = arith.mulf %12, %13 : vector<2x32xf32>
    %15 = arith.addf %9, %14 : vector<2x32xf32>
    %16 = vector.broadcast %3 : vector<1x32xf32> to vector<2x32xf32>
    %17 = arith.addf %15, %16 : vector<2x32xf32>
    %c0_9 = arith.constant 0 : index
    %c0_10 = arith.constant 0 : index
    %18 = vector.load %arg6[%c0_9, %c0_10] : memref<2x32xf32, #tpu.memory_space<vmem>>, vector<2x32xf32>
    tpu.vector_store %arg6[%c0_9, %c0_10], %17 {strides = array<i32>} : memref<2x32xf32, #tpu.memory_space<vmem>>, vector<2x32xf32>,
    %19 = vector.extract_strided_slice %0 {offsets = [0, 2], sizes = [2, 1], strides = [1, 1]} : vector<2x16xf32> to vector<2x1xf32>
    %20 = vector.extract_strided_slice %2 {offsets = [0, 0], sizes = [1, 32], strides = [1, 1]} : vector<2x32xf32> to vector<1x32xf32>
    %21 = vector.broadcast %19 : vector<2x1xf32> to vector<2x32xf32>
    %22 = vector.broadcast %20 : vector<1x32xf32> to vector<2x32xf32>
    %23 = arith.mulf %21, %22 : vector<2x32xf32>
    %24 = vector.extract_strided_slice %0 {offsets = [0, 3], sizes = [2, 1], strides = [1, 1]} : vector<2x16xf32> to vector<2x1xf32>
    %25 = vector.extract_strided_slice %2 {offsets = [1, 0], sizes = [1, 32], strides = [1, 1]} : vector<2x32xf32> to vector<1x32xf32>
    %26 = vector.broadcast %24 : vector<2x1xf32> to vector<2x32xf32>
    %27 = vector.broadcast %25 : vector<1x32xf32> to vector<2x32xf32>
    %28 = arith.mulf %26, %27 : vector<2x32xf32>
    %29 = arith.addf %23, %28 : vector<2x32xf32>
    %30 = vector.broadcast %4 : vector<1x32xf32> to vector<2x32xf32>
    %31 = arith.addf %29, %30 : vector<2x32xf32>
    %c0_11 = arith.constant 0 : index
    %c0_12 = arith.constant 0 : index
    %32 = vector.load %arg7[%c0_11, %c0_12] : memref<2x224xf32, #tpu.memory_space<vmem>>, vector<2x32xf32>
    tpu.vector_store %arg7[%c0_11, %c0_12], %31 {strides = array<i32>} : memref<2x224xf32, #tpu.memory_space<vmem>>, vector<2x32xf32>,
    %33 = vector.extract_strided_slice %0 {offsets = [0, 4], sizes = [2, 1], strides = [1, 1]} : vector<2x16xf32> to vector<2x1xf32>
    %34 = vector.extract_strided_slice %2 {offsets = [0, 0], sizes = [1, 32], strides = [1, 1]} : vector<2x32xf32> to vector<1x32xf32>
    %35 = vector.broadcast %33 : vector<2x1xf32> to vector<2x32xf32>
    %36 = vector.broadcast %34 : vector<1x32xf32> to vector<2x32xf32>
    %37 = arith.mulf %35, %36 : vector<2x32xf32>
    %38 = vector.extract_strided_slice %0 {offsets = [0, 5], sizes = [2, 1], strides = [1, 1]} : vector<2x16xf32> to vector<2x1xf32>
    %39 = vector.extract_strided_slice %2 {offsets = [1, 0], sizes = [1, 32], strides = [1, 1]} : vector<2x32xf32> to vector<1x32xf32>
    %40 = vector.broadcast %38 : vector<2x1xf32> to vector<2x32xf32>
    %41 = vector.broadcast %39 : vector<1x32xf32> to vector<2x32xf32>
    %42 = arith.mulf %40, %41 : vector<2x32xf32>
    %43 = arith.addf %37, %42 : vector<2x32xf32>
    %44 = vector.broadcast %4 : vector<1x32xf32> to vector<2x32xf32>
    %45 = arith.addf %43, %44 : vector<2x32xf32>
    %c0_13 = arith.constant 0 : index
    %c32 = arith.constant 32 : index
    %46 = vector.load %arg7[%c0_13, %c32] : memref<2x224xf32, #tpu.memory_space<vmem>>, vector<2x32xf32>
    tpu.vector_store %arg7[%c0_13, %c32], %45 {strides = array<i32>} : memref<2x224xf32, #tpu.memory_space<vmem>>, vector<2x32xf32>,
    %47 = vector.extract_strided_slice %0 {offsets = [0, 6], sizes = [2, 1], strides = [1, 1]} : vector<2x16xf32> to vector<2x1xf32>
    %48 = vector.extract_strided_slice %2 {offsets = [0, 0], sizes = [1, 32], strides = [1, 1]} : vector<2x32xf32> to vector<1x32xf32>
    %49 = vector.broadcast %47 : vector<2x1xf32> to vector<2x32xf32>
    %50 = vector.broadcast %48 : vector<1x32xf32> to vector<2x32xf32>
    %51 = arith.mulf %49, %50 : vector<2x32xf32>
    %52 = vector.extract_strided_slice %0 {offsets = [0, 7], sizes = [2, 1], strides = [1, 1]} : vector<2x16xf32> to vector<2x1xf32>
    %53 = vector.extract_strided_slice %2 {offsets = [1, 0], sizes = [1, 32], strides = [1, 1]} : vector<2x32xf32> to vector<1x32xf32>
    %54 = vector.broadcast %52 : vector<2x1xf32> to vector<2x32xf32>
    %55 = vector.broadcast %53 : vector<1x32xf32> to vector<2x32xf32>
    %56 = arith.mulf %54, %55 : vector<2x32xf32>
    %57 = arith.addf %51, %56 : vector<2x32xf32>
    %58 = vector.broadcast %4 : vector<1x32xf32> to vector<2x32xf32>
    %59 = arith.addf %57, %58 : vector<2x32xf32>
    %c0_14 = arith.constant 0 : index
    %c64 = arith.constant 64 : index
    %60 = vector.load %arg7[%c0_14, %c64] : memref<2x224xf32, #tpu.memory_space<vmem>>, vector<2x32xf32>
    tpu.vector_store %arg7[%c0_14, %c64], %59 {strides = array<i32>} : memref<2x224xf32, #tpu.memory_space<vmem>>, vector<2x32xf32>,
    %61 = vector.extract_strided_slice %0 {offsets = [0, 8], sizes = [2, 1], strides = [1, 1]} : vector<2x16xf32> to vector<2x1xf32>
    %62 = vector.extract_strided_slice %2 {offsets = [0, 0], sizes = [1, 32], strides = [1, 1]} : vector<2x32xf32> to vector<1x32xf32>
    %63 = vector.broadcast %61 : vector<2x1xf32> to vector<2x32xf32>
    %64 = vector.broadcast %62 : vector<1x32xf32> to vector<2x32xf32>
    %65 = arith.mulf %63, %64 : vector<2x32xf32>
    %66 = vector.extract_strided_slice %0 {offsets = [0, 9], sizes = [2, 1], strides = [1, 1]} : vector<2x16xf32> to vector<2x1xf32>
    %67 = vector.extract_strided_slice %2 {offsets = [1, 0], sizes = [1, 32], strides = [1, 1]} : vector<2x32xf32> to vector<1x32xf32>
    %68 = vector.broadcast %66 : vector<2x1xf32> to vector<2x32xf32>
    %69 = vector.broadcast %67 : vector<1x32xf32> to vector<2x32xf32>
    %70 = arith.mulf %68, %69 : vector<2x32xf32>
    %71 = arith.addf %65, %70 : vector<2x32xf32>
    %72 = vector.broadcast %4 : vector<1x32xf32> to vector<2x32xf32>
    %73 = arith.addf %71, %72 : vector<2x32xf32>
    %c0_15 = arith.constant 0 : index
    %c96 = arith.constant 96 : index
    %74 = vector.load %arg7[%c0_15, %c96] : memref<2x224xf32, #tpu.memory_space<vmem>>, vector<2x32xf32>
    tpu.vector_store %arg7[%c0_15, %c96], %73 {strides = array<i32>} : memref<2x224xf32, #tpu.memory_space<vmem>>, vector<2x32xf32>,
    %75 = vector.extract_strided_slice %0 {offsets = [0, 10], sizes = [2, 1], strides = [1, 1]} : vector<2x16xf32> to vector<2x1xf32>
    %76 = vector.extract_strided_slice %2 {offsets = [0, 0], sizes = [1, 32], strides = [1, 1]} : vector<2x32xf32> to vector<1x32xf32>
    %77 = vector.broadcast %75 : vector<2x1xf32> to vector<2x32xf32>
    %78 = vector.broadcast %76 : vector<1x32xf32> to vector<2x32xf32>
    %79 = arith.mulf %77, %78 : vector<2x32xf32>
    %80 = vector.extract_strided_slice %0 {offsets = [0, 11], sizes = [2, 1], strides = [1, 1]} : vector<2x16xf32> to vector<2x1xf32>
    %81 = vector.extract_strided_slice %2 {offsets = [1, 0], sizes = [1, 32], strides = [1, 1]} : vector<2x32xf32> to vector<1x32xf32>
    %82 = vector.broadcast %80 : vector<2x1xf32> to vector<2x32xf32>
    %83 = vector.broadcast %81 : vector<1x32xf32> to vector<2x32xf32>
    %84 = arith.mulf %82, %83 : vector<2x32xf32>
    %85 = arith.addf %79, %84 : vector<2x32xf32>
    %86 = vector.broadcast %4 : vector<1x32xf32> to vector<2x32xf32>
    %87 = arith.addf %85, %86 : vector<2x32xf32>
    %c0_16 = arith.constant 0 : index
    %c128 = arith.constant 128 : index
    %88 = vector.load %arg7[%c0_16, %c128] : memref<2x224xf32, #tpu.memory_space<vmem>>, vector<2x32xf32>
    tpu.vector_store %arg7[%c0_16, %c128], %87 {strides = array<i32>} : memref<2x224xf32, #tpu.memory_space<vmem>>, vector<2x32xf32>,
    %89 = vector.extract_strided_slice %0 {offsets = [0, 12], sizes = [2, 1], strides = [1, 1]} : vector<2x16xf32> to vector<2x1xf32>
    %90 = vector.extract_strided_slice %2 {offsets = [0, 0], sizes = [1, 32], strides = [1, 1]} : vector<2x32xf32> to vector<1x32xf32>
    %91 = vector.broadcast %89 : vector<2x1xf32> to vector<2x32xf32>
    %92 = vector.broadcast %90 : vector<1x32xf32> to vector<2x32xf32>
    %93 = arith.mulf %91, %92 : vector<2x32xf32>
    %94 = vector.extract_strided_slice %0 {offsets = [0, 13], sizes = [2, 1], strides = [1, 1]} : vector<2x16xf32> to vector<2x1xf32>
    %95 = vector.extract_strided_slice %2 {offsets = [1, 0], sizes = [1, 32], strides = [1, 1]} : vector<2x32xf32> to vector<1x32xf32>
    %96 = vector.broadcast %94 : vector<2x1xf32> to vector<2x32xf32>
    %97 = vector.broadcast %95 : vector<1x32xf32> to vector<2x32xf32>
    %98 = arith.mulf %96, %97 : vector<2x32xf32>
    %99 = arith.addf %93, %98 : vector<2x32xf32>
    %100 = vector.broadcast %4 : vector<1x32xf32> to vector<2x32xf32>
    %101 = arith.addf %99, %100 : vector<2x32xf32>
    %c0_17 = arith.constant 0 : index
    %c160 = arith.constant 160 : index
    %102 = vector.load %arg7[%c0_17, %c160] : memref<2x224xf32, #tpu.memory_space<vmem>>, vector<2x32xf32>
    tpu.vector_store %arg7[%c0_17, %c160], %101 {strides = array<i32>} : memref<2x224xf32, #tpu.memory_space<vmem>>, vector<2x32xf32>,
    %103 = vector.extract_strided_slice %0 {offsets = [0, 14], sizes = [2, 1], strides = [1, 1]} : vector<2x16xf32> to vector<2x1xf32>
    %104 = vector.extract_strided_slice %2 {offsets = [0, 0], sizes = [1, 32], strides = [1, 1]} : vector<2x32xf32> to vector<1x32xf32>
    %105 = vector.broadcast %103 : vector<2x1xf32> to vector<2x32xf32>
    %106 = vector.broadcast %104 : vector<1x32xf32> to vector<2x32xf32>
    %107 = arith.mulf %105, %106 : vector<2x32xf32>
    %108 = vector.extract_strided_slice %0 {offsets = [0, 15], sizes = [2, 1], strides = [1, 1]} : vector<2x16xf32> to vector<2x1xf32>
    %109 = vector.extract_strided_slice %2 {offsets = [1, 0], sizes = [1, 32], strides = [1, 1]} : vector<2x32xf32> to vector<1x32xf32>
    %110 = vector.broadcast %108 : vector<2x1xf32> to vector<2x32xf32>
    %111 = vector.broadcast %109 : vector<1x32xf32> to vector<2x32xf32>
    %112 = arith.mulf %110, %111 : vector<2x32xf32>
    %113 = arith.addf %107, %112 : vector<2x32xf32>
    %114 = vector.broadcast %4 : vector<1x32xf32> to vector<2x32xf32>
    %115 = arith.addf %113, %114 : vector<2x32xf32>
    %c0_18 = arith.constant 0 : index
    %c192 = arith.constant 192 : index
    %116 = vector.load %arg7[%c0_18, %c192] : memref<2x224xf32, #tpu.memory_space<vmem>>, vector<2x32xf32>
    tpu.vector_store %arg7[%c0_18, %c192], %115 {strides = array<i32>} : memref<2x224xf32, #tpu.memory_space<vmem>>, vector<2x32xf32>,
    return
  }
  func.func @transform_0(%arg0: i32) -> (i32, i32) {
    %c0_i32 = arith.constant 0 : i32
    %c0_i32_0 = arith.constant 0 : i32
    return %arg0, %c0_i32 : i32, i32
  }
  func.func @transform_1(%arg0: i32) -> (i32, i32) {
    %c0_i32 = arith.constant 0 : i32
    %c0_i32_0 = arith.constant 0 : i32
    %c0_i32_1 = arith.constant 0 : i32
    return %c0_i32, %c0_i32_0 : i32, i32
  }
  func.func @transform_2(%arg0: i32) -> (i32, i32) {
    %c0_i32 = arith.constant 0 : i32
    %c0_i32_0 = arith.constant 0 : i32
    %c0_i32_1 = arith.constant 0 : i32
    return %c0_i32, %c0_i32_0 : i32, i32
  }
  func.func @transform_3(%arg0: i32) -> (i32, i32) {
    %c0_i32 = arith.constant 0 : i32
    %c0_i32_0 = arith.constant 0 : i32
    %c0_i32_1 = arith.constant 0 : i32
    return %c0_i32, %c0_i32_0 : i32, i32
  }
  func.func @transform_4(%arg0: i32) -> (i32, i32) {
    %c0_i32 = arith.constant 0 : i32
    %c0_i32_0 = arith.constant 0 : i32
    %c0_i32_1 = arith.constant 0 : i32
    return %c0_i32, %c0_i32_0 : i32, i32
  }
  func.func @transform_5(%arg0: i32) -> (i32, i32) {
    %c0_i32 = arith.constant 0 : i32
    %c0_i32_0 = arith.constant 0 : i32
    return %arg0, %c0_i32 : i32, i32
  }
  func.func @transform_6(%arg0: i32) -> (i32, i32) {
    %c0_i32 = arith.constant 0 : i32
    %c0_i32_0 = arith.constant 0 : i32
    return %arg0, %c0_i32 : i32, i32
  }
}

</mosaic_0001>

<bundles_post_ra>
// kernel: tpu_custom_call.1
= control target key start
LH: loop header
LB: loop body
LE: loop exit
PB: predicated region body
PF: predicated region fallthrough
CT: control target
= control target key end

     0   :  { %12 = vsyncpa [#allocation3], 0  ;;  %s498_s0 = inlined_call_operand.hbm [shape: f32[2,16], index: 0, kind: input, shape index: {}]   ;;  %s499_s1 = inlined_call_operand.vmem [shape: f32[2,32], index: 1, kind: input, shape index: {}]   ;;  %s500_s2 = inlined_call_operand.vmem [shape: f32[1,32], index: 2, kind: input, shape index: {}]   ;;  %s501_s3 = inlined_call_operand.vmem [shape: f32[2,32], index: 3, kind: input, shape index: {}]   ;;  %s502_s4 = inlined_call_operand.vmem [shape: f32[1,32], index: 4, kind: input, shape index: {}]   ;;  %s503_s5 = inlined_call_operand.hbm [shape: f32[2,32], index: 5, kind: output, shape index: {0}]   ;;  %s504_s6 = inlined_call_operand.hbm [shape: f32[2,224], index: 6, kind: output, shape index: {1}]  }
   0x1   :  { %13 = vsyncpa [#allocation4], 0 }
   0x2   :  { %14 = vsyncpa [#allocation7], 0  ;;  %s376_s21 = smov [#allocation2]   ;;  %s304_s25 = scalar_lea.hbm %s498_s0, 32 }
   0x3   :  { %s21_s22 = sshll.u32 %s376_s21, 4  ;;  %p305_p0 = scmp.ne.s32.totalorder %s498_s0, %s304_s25  ;;  %s22_s22 = int_to_ptr.vmem [resolvable:$true] %s21_s22 }
   0x4   :  { %p308_p1 = scmp.lt.u32.totalorder %s304_s25, %s498_s0 }
   0x6   :  { %p310_p2 = pnand %p308_p1, %p305_p0 }
   0x8   :  { %313 = shalt.err (!%p310_p2)
}
   0x9   :  { %s314_s30 = scalar_lea.vmem %s22_s22, 32  ;;  %p319_p4 = scmp.lt.s32.totalorder %s22_s22, %s22_s22 }
   0xa   :  { %p315_p3 = scmp.ne.s32.totalorder %s22_s22, %s314_s30  ;;  %p320_p5 = scmp.lt.s32.totalorder %s314_s30, %s314_s30 }
   0xc   :  { %p321_p6 = por %p320_p5, %p319_p4 }
   0xe   :  { %p322_p7 = pnand %p321_p6, %p315_p3 }
  0x10   :  { %325 = shalt.err (!%p322_p7)
}
  0x11   :  { %24 = dma.hbm_to_vmem [thread:$0]  %s498_s0, 32, %s22_s22, [#allocation3]  }
  0x12   :  { %370 = dma.done.wait [#allocation3], 32  }
  0x13   :  { %371 = vsyncadd [#allocation3], 4294967264  ;;  %v377_v0 = vmov 6   ;;  %v378_v1 = vmov 4   ;;  %v36_v2 = vld [vmem:[#allocation2] sm:$0x3]  ;;  %v46_v17 = vlaneseq }
  0x14   :  { %289 = vset.pattern.permute.xlu1 %v377_v0  ;;  %287 = vset.pattern.permute.xlu0 %v378_v1  ;;  %v379_v3 = vmov 7   ;;  %v380_v4 = vmov 5   ;;  %v381_v5 = vmov 12   ;;  %v382_v6 = vmov 13   ;;  %v38_v21 = vld [vmem:[%s501_s3] sm:$0x3] }
  0x15   :  { %123 = vperm.xlu1 %289, %v36_v2   ;;  %98 = vperm.xlu0 %287, %v36_v2   ;;  %v383_v7 = vmov 8   ;;  %v384_v8 = vmov 14   ;;  %v385_v9 = vmov 9   ;;  %v386_v10 = vmov 3   ;;  %v263_v35 = vld [vmem:[%s502_s4] ss:$0 sm:$0xff] }
  0x16   :  { %v387_v11 = vmov 15   ;;  %v388_v12 = vmov 0   ;;  %v389_v13 = vmov 2   ;;  %v390_v14 = vmov 10   ;;  %s394_s3 = smov 64   ;;  %s395_s12 = smov 32  }
  0x17   :  { %v391_v15 = vmov 11   ;;  %v392_v16 = vmov 1   ;;  %v446_v18 = vshrl.u32 %v46_v17, 7  ;;  %v393_v24 = vmov 1983009808   ;;  %s396_s4 = smov 96  }
  0x18   :  { %v111_v25 = vunpack.c.l.s4 %v393_v24  ;;  %vm68_vm0 = vcmask 254976  }
  0x19   :  { %290 = vset.pattern.permute.xlu1 %v379_v3  ;;  %288 = vset.pattern.permute.xlu0 %v380_v4  ;;  %v48_v19 = vsub.s32 0, %v446_v18  ;;  %v57_v20 = vsub.s32 1, %v446_v18 }
  0x1a   :  { %128 = vperm.xlu1 %290, %v36_v2   ;;  %103 = vperm.xlu0 %288, %v36_v2   ;;  %v112_v29 = vunpack.c.0.s8 %v111_v25 }
  0x1b   :  { %v77_v26 = vrot.slane %v38_v21, %v48_v19  ;;  %v86_v27 = vrot.slane %v38_v21, %v57_v20 }
  0x1c   :  { %v115_v38 = vsub.s32 %v112_v29, %v446_v18 }
  0x1e   :  { %291 = vset.pattern.permute.xlu1 %v381_v5  ;;  %292 = vset.pattern.permute.xlu0 %v382_v6 }
  0x1f   :  { %186 = vperm.xlu1 %291, %v36_v2   ;;  %191 = vperm.xlu0 %292, %v36_v2  }
  0x23   :  { %293 = vset.pattern.permute.xlu1 %v383_v7  ;;  %295 = vset.pattern.permute.xlu0 %v384_v8  ;;  %v37_v7 = vld [vmem:[%s499_s1] sm:$0x3]  ;;  %s397_s1 = smov [#allocation5]  }
  0x24   :  { %148 = vperm.xlu1 %293, %v36_v2   ;;  %210 = vperm.xlu0 %295, %v36_v2   ;;  %s239_s17 = sshll.u32 %s397_s1, 4  ;;  %s240_s17 = int_to_ptr.vmem [resolvable:$true] %s239_s17 }
  0x25   :  { %s326_s18 = scalar_lea.vmem %s240_s17, 32  ;;  %p331_p9 = scmp.lt.s32.totalorder %s240_s17, %s240_s17 }
  0x26   :  { %p327_p8 = scmp.ne.s32.totalorder %s240_s17, %s326_s18  ;;  %p332_p10 = scmp.lt.s32.totalorder %s326_s18, %s326_s18 }
  0x28   :  { %294 = vset.pattern.permute.xlu1 %v385_v9  ;;  %298 = vset.pattern.permute.xlu0 %v386_v10  ;;  %v49_v10 = vrot.slane %v37_v7, %v48_v19  ;;  %p333_p11 = por %p332_p10, %p331_p9 }
  0x29   :  { %153 = vperm.xlu1 %294, %v36_v2   ;;  %80 = vperm.xlu0 %298, %v36_v2  }
  0x2a   :  { %p334_p12 = pnand %p333_p11, %p327_p8 }
  0x2d   :  { %296 = vset.pattern.permute.xlu1 %v387_v11  ;;  %301 = vset.pattern.permute.xlu0 %v388_v12  ;;  %v58_v12 = vrot.slane %v37_v7, %v57_v20 }
  0x2e   :  { %215 = vperm.xlu1 %296, %v36_v2   ;;  %43 = vperm.xlu0 %301, %v36_v2  }
  0x32   :  { %297 = vset.pattern.permute.xlu1 %v389_v13  ;;  %303 = vset.pattern.permute.xlu0 %v387_v11 }
  0x33   :  { %71 = vperm.xlu1 %297, %v36_v2  }
  0x37   :  { %299 = vset.pattern.permute.xlu1 %v390_v14 }
  0x38   :  { %173 = vperm.xlu1 %299, %v36_v2  }
  0x3c   :  { %300 = vset.pattern.permute.xlu1 %v391_v15 }
  0x3d   :  { %178 = vperm.xlu1 %300, %v36_v2  }
  0x41   :  { %302 = vset.pattern.permute.xlu1 %v392_v16 }
  0x42   :  { %52 = vperm.xlu1 %302, %v36_v2  }
  0x94   :  { %v124_v22 = vpop.permute.xlu1 %123  ;;  %v99_v23 = vpop.permute.xlu0 %98 }
  0x95   :  { %v101_v28 = vmul.f32 %v99_v23, %v77_v26  ;;  %v126_v32 = vmul.f32 %v124_v22, %v77_v26  ;;  %v262_v22 = vld [vmem:[%s500_s2] ss:$0 sm:$0xff] }
  0x99   :  { %v129_v30 = vpop.permute.xlu1 %128  ;;  %v104_v31 = vpop.permute.xlu0 %103 }
  0x9a   :  { %v131_v33 = vmul.f32 %v129_v30, %v86_v27  ;;  %v106_v34 = vmul.f32 %v104_v31, %v86_v27 }
  0x9c   :  { %v132_v36 = vadd.f32 %v131_v33, %v126_v32  ;;  %v107_v37 = vadd.f32 %v106_v34, %v101_v28 }
  0x9e   :  { %v133_v39 = vadd.f32 %v263_v35, %v132_v36  ;;  %v108_v40 = vadd.f32 %v263_v35, %v107_v37  ;;  %v187_v41 = vpop.permute.xlu1 %186  ;;  %v192_v42 = vpop.permute.xlu0 %191 }
  0x9f   :  { %v189_v43 = vmul.f32 %v187_v41, %v77_v26  ;;  %v194_v44 = vmul.f32 %v192_v42, %v86_v27 }
  0xa0   :  { %v141_v45 = vrot.slane %v133_v39, %v115_v38  ;;  %v116_v46 = vrot.slane %v108_v40, %v115_v38 }
  0xa1   :  { %v195_v47 = vadd.f32 %v194_v44, %v189_v43 }
  0xa2   :  { %142 = vrot.lane.b32.xlu0 %v141_v45, %s394_s3  ;;  %117 = vrot.lane.b32.xlu1 %v116_v46, %s395_s12 }
  0xa3   :  { %v196_v48 = vadd.f32 %v263_v35, %v195_v47  ;;  %v149_v49 = vpop.permute.xlu1 %148  ;;  %v211_v54 = vpop.permute.xlu0 %210 }
  0xa4   :  { %v151_v52 = vmul.f32 %v149_v49, %v77_v26  ;;  %v213_v56 = vmul.f32 %v211_v54, %v77_v26 }
  0xa5   :  { %v204_v50 = vrot.slane %v196_v48, %v115_v38 }
  0xa7   :  { %205 = vrot.lane.b32.xlu1 %v204_v50, %s395_s12 }
  0xa8   :  { %v154_v51 = vpop.permute.xlu1 %153  ;;  %v81_v60 = vpop.permute.xlu0 %80 }
  0xa9   :  { %v156_v53 = vmul.f32 %v154_v51, %v86_v27  ;;  %v87_v63 = vmul.f32 %v86_v27, %v81_v60 }
  0xab   :  { %v157_v55 = vadd.f32 %v156_v53, %v151_v52 }
  0xad   :  { %v158_v57 = vadd.f32 %v263_v35, %v157_v55  ;;  %v216_v58 = vpop.permute.xlu1 %215  ;;  %v44_v14 = vpop.permute.xlu0 %43 }
  0xae   :  { %v218_v59 = vmul.f32 %v216_v58, %v86_v27  ;;  %v50_v15 = vmul.f32 %v49_v10, %v44_v14 }
  0xaf   :  { %v166_v61 = vrot.slane %v158_v57, %v115_v38 }
  0xb0   :  { %v219_v62 = vadd.f32 %v218_v59, %v213_v56 }
  0xb1   :  { %167 = vrot.lane.b32.xlu0 %v166_v61, %s396_s4 }
  0xb2   :  { %v220_v0 = vadd.f32 %v263_v35, %v219_v62  ;;  %v72_v1 = vpop.permute.xlu1 %71 }
  0xb3   :  { %v78_v2 = vmul.f32 %v77_v26, %v72_v1 }
  0xb4   :  { %v228_v3 = vrot.slane %v220_v0, %v115_v38 }
  0xb5   :  { %v88_v4 = vadd.f32 %v87_v63, %v78_v2 }
  0xb6   :  { %229 = vrot.lane.b32.xlu1 %v228_v3, %s394_s3 }
  0xb7   :  { %v174_v5 = vpop.permute.xlu1 %173  ;;  %v95_v6 = vadd.f32 %v263_v35, %v88_v4 }
  0xb8   :  { %v176_v8 = vmul.f32 %v174_v5, %v77_v26 }
  0xb9   :  { %96 = vst.msk [vmem:[#allocation6] sm:$0x3] %vm68_vm0, %v95_v6 }
  0xbc   :  { %v179_v9 = vpop.permute.xlu1 %178 }
  0xbd   :  { %v181_v11 = vmul.f32 %v179_v9, %v86_v27 }
  0xbf   :  { %v182_v13 = vadd.f32 %v181_v11, %v176_v8 }
  0xc1   :  { %v183_v16 = vadd.f32 %v263_v35, %v182_v13  ;;  %v53_v17 = vpop.permute.xlu1 %52 }
  0xc2   :  { %v59_v21 = vmul.f32 %v58_v12, %v53_v17 }
  0xc3   :  { %184 = vst.msk [vmem:[#allocation6 + $0x2] sm:$0x3] %vm68_vm0, %v183_v16 }
  0xc4   :  { %v60_v23 = vadd.f32 %v59_v21, %v50_v15 }
  0xc6   :  { %v67_v19 = vadd.f32 %v262_v22, %v60_v23 }
  0xc8   :  { %69 = vst.msk [vmem:[#allocation5] sm:$0x3] %vm68_vm0, %v67_v19 }
  0xc9   :  { %337 = shalt.err (!%p334_p12)
}
  0xca   :  { %s338_s2 = scalar_lea.hbm %s503_s5, 32 }
  0xcb   :  { %p339_p13 = scmp.ne.s32.totalorder %s503_s5, %s338_s2  ;;  %p342_p0 = scmp.lt.u32.totalorder %s338_s2, %s503_s5 }
  0xcd   :  { %p344_p1 = pnand %p342_p0, %p339_p13 }
  0xcf   :  { %347 = shalt.err (!%p344_p1)
}
  0xd0   :  { %242 = dma.vmem_to_hbm [thread:$0]  %s240_s17, 32, %s503_s5, [#allocation4]   ;;  %vm120_vm1 = vcmask 517376   ;;  %vm145_vm2 = vcmask 779776   ;;  %vm170_vm3 = vcmask 1042176  }
  0xd1   :  { %s398_s27 = smov [#allocation6]  }
  0xd2   :  { %s249_s28 = sshll.u32 %s398_s27, 4  ;;  %s250_s28 = int_to_ptr.vmem [resolvable:$true] %s249_s28 }
  0xd3   :  { %s348_s29 = scalar_lea.vmem %s250_s28, 64  ;;  %p353_p3 = scmp.lt.s32.totalorder %s250_s28, %s250_s28 }
  0xd4   :  { %p349_p2 = scmp.ne.s32.totalorder %s250_s28, %s348_s29  ;;  %p354_p4 = scmp.lt.s32.totalorder %s348_s29, %s348_s29 }
  0xd6   :  { %p355_p5 = por %p354_p4, %p353_p3 }
  0xd8   :  { %p356_p6 = pnand %p355_p5, %p349_p2 }
 0x114   :  { %v118_v18 = vpop.permute.xlu1 %117  ;;  %v143_v20 = vpop.permute.xlu0 %142 }
 0x115   :  { %121 = vst.msk [vmem:[#allocation6] sm:$0x3] %vm120_vm1, %v118_v18 }
 0x116   :  { %146 = vst.msk [vmem:[#allocation6] sm:$0x3] %vm145_vm2, %v143_v20 }
 0x119   :  { %v206_v24 = vpop.permute.xlu1 %205 }
 0x11a   :  { %208 = vst.msk [vmem:[#allocation6 + $0x2] sm:$0x3] %vm120_vm1, %v206_v24 }
 0x123   :  { %v168_v25 = vpop.permute.xlu0 %167 }
 0x124   :  { %171 = vst.msk [vmem:[#allocation6] sm:$0x3] %vm170_vm3, %v168_v25 }
 0x128   :  { %v230_v26 = vpop.permute.xlu1 %229 }
 0x129   :  { %232 = vst.msk [vmem:[#allocation6 + $0x2] sm:$0x3] %vm145_vm2, %v230_v26 }
 0x12a   :  { %359 = shalt.err (!%p356_p6)
}
 0x12b   :  { %s360_s7 = scalar_lea.hbm %s504_s6, 64 }
 0x12c   :  { %p361_p7 = scmp.ne.s32.totalorder %s504_s6, %s360_s7  ;;  %p364_p8 = scmp.lt.u32.totalorder %s360_s7, %s504_s6 }
 0x12e   :  { %p366_p9 = pnand %p364_p8, %p361_p7 }
 0x130   :  { %369 = shalt.err (!%p366_p9)
}
 0x131   :  { %252 = dma.vmem_to_hbm [thread:$0]  %s250_s28, 64, %s504_s6, [#allocation7]  }
 0x132   :  { %372 = dma.done.wait [#allocation4], 32  }
 0x133   :  { %373 = vsyncadd [#allocation4], 4294967264 }
 0x134   :  { %374 = dma.done.wait [#allocation7], 64  }
 0x135   :  { %375 = vsyncadd [#allocation7], 4294967232 }
 0x136   :  { %259 = vsyncpa [#allocation3], 1 }
 0x137   :  { %260 = vsyncpa [#allocation4], 1 }
 0x138   :  { %261 = vsyncpa [#allocation7], 1 }

</bundles_post_ra>
